<compile_context>
chip_gen: v5e
topology: v5e:2x2
jax: 0.10.0
libtpu: 0.0.40
codegen_flags: <defaults>
</compile_context>

<pallas_src>
import functools

import jax
import jax.numpy as jnp
from jax.experimental import pallas as pl
from jax.experimental.pallas import tpu as pltpu

LANE = 128
TARGET_TILE_BYTES = 4 * 1024 * 1024  # ~4 MiB per input buffer (8 MiB double-buffered)


def _round_down(x, m):
    return (x // m) * m


def _num_tensorcores_per_chip():
    """Best-effort per-chip TensorCore count (2 on v7x, 1 on v5e/v6e)."""
    try:
        kind = jax.devices()[0].device_kind.lower()
    except Exception:
        return 1
    if "v7" in kind or "7x" in kind:
        return 2
    return 1


def _make_kernel(gan_type, target_val, target_is_real, n, tile_rows, inner, ncores):
    """Per-element GAN loss + partial-sum accumulation into an (8,128) f32 vreg slab."""
    tile_elems = tile_rows * LANE

    def per_elem(x):
        x = x.astype(jnp.float32)
        if gan_type in ("gan", "ragan"):
            # BCEWithLogitsLoss vs constant target t:
            #   max(x,0) - x*t + log(1 + exp(-|x|))   (one exp + one log on the EUP)
            t = jnp.float32(target_val)
            return jnp.maximum(x, 0.0) - x * t + jnp.log(1.0 + jnp.exp(-jnp.abs(x)))
        if gan_type == "lsgan":
            d = x - jnp.float32(target_val)
            return d * d
        # wgan-gp: -mean(x) if target_is_real else mean(x); sign folded per element.
        sign = jnp.float32(-1.0 if target_is_real else 1.0)
        return sign * x

    def kernel(x_ref, out_ref, acc_ref):
        if ncores == 1:
            c = 0
            i = pl.program_id(0)
        else:
            c = pl.program_id(0)       # TensorCore split (core_parallel)
            i = pl.program_id(1)       # reduction steps within this core (arbitrary)

        @pl.when(i == 0)
        def _():
            acc_ref[...] = jnp.zeros_like(acc_ref)

        # Flat element index of the first element of this tile.
        tile_start = (c * inner + i) * tile_elems

        def accum(vals):
            # VPU-only vreg adds into the (8,128) accumulator; the single
            # cross-lane reduce happens once on the tiny output in the wrapper.
            full = _round_down(tile_rows, 8)
            if full:
                acc_ref[...] += vals[:full].reshape(full // 8, 8, LANE).sum(axis=0)
            rem = tile_rows - full
            if rem:  # tiny single-tile inputs only
                acc_ref[:rem, :] = acc_ref[:rem, :] + vals[full:, :]

        # Interior tiles: fully in-bounds -> unmasked accumulate.
        @pl.when(tile_start + tile_elems <= n)
        def _():
            accum(per_elem(x_ref[...]))

        # Partial tail tile: mask garbage / padding with a select (NaN-safe —
        # do NOT turn this into a multiply-by-mask).
        @pl.when(jnp.logical_and(tile_start < n, tile_start + tile_elems > n))
        def _():
            per = per_elem(x_ref[...])
            rid = jax.lax.broadcasted_iota(jnp.int32, (tile_rows, LANE), 0)
            lid = jax.lax.broadcasted_iota(jnp.int32, (tile_rows, LANE), 1)
            gidx = tile_start + rid * LANE + lid
            accum(jnp.where(gidx < n, per, 0.0))

        # Fully out-of-range dummy step (odd tile count split across 2 cores):
        # no compute runs, and its block index is clamped in the index_map so no
        # extra DMA is issued either.

        @pl.when(i == inner - 1)
        def _():
            out_ref[...] = acc_ref[...]

    return kernel


@functools.lru_cache(maxsize=None)
def _build_loss_fn(n, dtype_name, gan_type, target_val, target_is_real):
    """Build & jit a scalar-loss function for a fixed element count / dtype / config."""
    assert 0 < n < 2 ** 31, "int32 flat-index math in the kernel requires n < 2**31"

    itemsize = jnp.dtype(dtype_name).itemsize
    sub = 8 * max(1, 4 // itemsize)           # f32 -> 8 sublanes, bf16 -> 16, int8 -> 32

    rows = pl.cdiv(n, LANE)                   # lane rows covering n elements
    target_rows = max(sub, _round_down(TARGET_TILE_BYTES // (LANE * itemsize), sub))
    if rows >= sub:
        tile_rows = min(target_rows, _round_down(rows, sub))
    else:
        tile_rows = rows                      # single block == full array dims (allowed)
    num_tiles = pl.cdiv(rows, tile_rows)

    ncores = 2 if (_num_tensorcores_per_chip() >= 2 and num_tiles >= 2) else 1
    inner = pl.cdiv(num_tiles, ncores)
    last_block = num_tiles - 1

    kernel = _make_kernel(gan_type, target_val, target_is_real,
                          n, tile_rows, inner, ncores)

    if ncores == 1:
        grid = (inner,)
        in_spec = pl.BlockSpec((tile_rows, LANE), lambda i: (i, 0))
        out_spec = pl.BlockSpec((8, LANE), lambda i: (0, 0))
        dims = ("arbitrary",)
    else:
        grid = (ncores, inner)
        # Clamp the over-range step (odd num_tiles) to the previous block index:
        # Pallas skips the repeat DMA and the kernel pl.when-skips its compute.
        in_spec = pl.BlockSpec(
            (tile_rows, LANE),
            lambda c, i: (jnp.minimum(c * inner + i, last_block), 0))
        out_spec = pl.BlockSpec((8, LANE), lambda c, i: (c, 0))
        core_parallel = getattr(pltpu, "CORE_PARALLEL", "parallel")
        dims = (core_parallel, "arbitrary")

    call = pl.pallas_call(
        kernel,
        out_shape=jax.ShapeDtypeStruct((ncores * 8, LANE), jnp.float32),
        grid_spec=pltpu.PrefetchScalarGridSpec(
            num_scalar_prefetch=0,
            grid=grid,
            in_specs=[in_spec],
            out_specs=out_spec,
            scratch_shapes=[pltpu.VMEM((8, LANE), jnp.float32)],
        ),
        compiler_params=pltpu.CompilerParams(
            dimension_semantics=dims,
            vmem_limit_bytes=32 * 1024 * 1024,
        ),
    )

    pad = rows * LANE - n     # < 128; zero whenever n is a multiple of 128 (common case)

    def fn(x):
        xf = x.reshape(-1)                    # free; original dtype streamed to the kernel
        if pad:
            # TODO(synk): eliminate this remaining HBM copy for the rare
            # n % 128 != 0 case (e.g. handle the last ragged lane row in-kernel).
            xf = jnp.pad(xf, (0, pad))
        out = call(xf.reshape(rows, LANE))    # no copy when pad == 0
        return jnp.sum(out) / jnp.float32(n)

    return jax.jit(fn)


class GANLossPallas:
    """JAX/Pallas port of codes/models/loss.py::GANLoss forward semantics."""

    def __init__(self, gan_type, real_label_val=1.0, fake_label_val=0.0):
        self.gan_type = gan_type.lower()
        self.real_label_val = float(real_label_val)
        self.fake_label_val = float(fake_label_val)
        if self.gan_type not in ("gan", "ragan", "lsgan", "wgan-gp"):
            raise NotImplementedError(
                "GAN type [{:s}] is not found".format(self.gan_type)
            )

    def _single(self, inp, target_is_real):
        target_val = self.real_label_val if target_is_real else self.fake_label_val
        fn = _build_loss_fn(
            int(inp.size),
            jnp.dtype(inp.dtype).name,
            self.gan_type,
            float(target_val),
            bool(target_is_real),
        )
        return fn(inp)

    def forward(self, inputs, target_is_real):
        if isinstance(inputs, (tuple, list)):
            if len(inputs) == 1:
                return self._single(inputs[0], target_is_real)
            # TODO(synk): fuse the multi-tensor list path into a single pallas_call
            # (scalar-prefetched per-tensor offsets/counts + per-tensor 1/n weights).
            losses = [self._single(inp, target_is_real) for inp in inputs]
            return jnp.sum(jnp.stack(losses))
        return self._single(inputs, target_is_real)

    __call__ = forward


# ---- pure-JAX references for verification -------------------------------------------
def _ref_single(x, gan_type, target_val, target_is_real):
    x = x.astype(jnp.float32)
    if gan_type in ("gan", "ragan"):
        t = jnp.float32(target_val)
        per = jnp.maximum(x, 0.0) - x * t + jnp.log1p(jnp.exp(-jnp.abs(x)))
        return jnp.mean(per)
    if gan_type == "lsgan":
        return jnp.mean((x - jnp.float32(target_val)) ** 2)
    # wgan-gp
    return -jnp.mean(x) if target_is_real else jnp.mean(x)


if __name__ == "__main__":
    key = jax.random.PRNGKey(0)
    k1, k2, k3, k4 = jax.random.split(key, 4)
    # NCHW discriminator logits
    x = jax.random.normal(k1, (2, 4, 16, 16), dtype=jnp.float32)        # n % 128 == 0
    x_small = jax.random.normal(k2, (2, 4, 8, 8), dtype=jnp.float32)    # tiny tile
    x_ragged = jax.random.normal(k3, (2, 3, 11, 7), dtype=jnp.float32)  # n % 128 != 0
    x_bf16 = jax.random.normal(k4, (2, 4, 16, 16), dtype=jnp.bfloat16)  # packed dtype

    ok = True
    for gtype in ("gan", "ragan", "lsgan", "wgan-gp"):
        crit = GANLossPallas(gtype, real_label_val=1.0, fake_label_val=0.0)
        for target_is_real in (True, False):
            tval = 1.0 if target_is_real else 0.0

            for inp in (x, x_small, x_ragged, x_bf16):
                got = jax.block_until_ready(crit(inp, target_is_real))
                want = _ref_single(inp, gtype, tval, target_is_real)
                ok &= bool(jnp.allclose(got, want, atol=1e-5, rtol=1e-5))

            # list input path: sum of per-tensor losses
            got_list = jax.block_until_ready(crit([x, x_small], target_is_real))
            want_list = _ref_single(x, gtype, tval, target_is_real) + _ref_single(
                x_small, gtype, tval, target_is_real
            )
            ok &= bool(jnp.allclose(got_list, want_list, atol=1e-5, rtol=1e-5))

    if ok:
        print("KERNEL_OK")
    else:
        print("KERNEL_MISMATCH")
</pallas_src>

<mosaic_0001>
module attributes {stable_mosaic.version = 11 : i64} {
  func.func @kernel(%arg0: i32, %arg1: memref<16x128xf32, #tpu.memory_space<vmem>>, %arg2: memref<8x128xf32, #tpu.memory_space<vmem>>, %arg3: memref<8x128xf32, #tpu.memory_space<vmem>>) attributes {dimension_semantics = [#tpu.dimension_semantics<arbitrary>], iteration_bounds = array<i64: 1>, scalar_prefetch = 0 : i64, scratch_operands = 1 : i64, tpu.core_type = #tpu.core_type<tc>, window_params = [{transform_indices = @transform_0, window_bounds = array<i64: 16, 128>}, {pipeline_mode = #tpu.pipeline_mode<synchronous>, transform_indices = @transform_1, window_bounds = array<i64: 8, 128>}]} {
    %c0_i32 = arith.constant 0 : i32
    %0 = arith.cmpi eq, %arg0, %c0_i32 : i32
    %1 = arith.extui %0 : i1 to i32
    %c0_i32_0 = arith.constant 0 : i32
    %2 = arith.cmpi ne, %1, %c0_i32_0 : i32
    scf.if %2 {
      %cst = arith.constant 0.000000e+00 : f32
      %18 = vector.broadcast %cst : f32 to vector<8x128xf32>
      %c0 = arith.constant 0 : index
      %c0_11 = arith.constant 0 : index
      %19 = vector.load %arg3[%c0, %c0_11] : memref<8x128xf32, #tpu.memory_space<vmem>>, vector<8x128xf32>
      tpu.vector_store %arg3[%c0, %c0_11], %18 {strides = array<i32>} : memref<8x128xf32, #tpu.memory_space<vmem>>, vector<8x128xf32>,
    } else {
    }
    %c0_i32_1 = arith.constant 0 : i32
    %3 = arith.addi %c0_i32_1, %arg0 : i32
    %c2048_i32 = arith.constant 2048 : i32
    %4 = arith.muli %3, %c2048_i32 : i32
    %c2048_i32_2 = arith.constant 2048 : i32
    %5 = arith.addi %4, %c2048_i32_2 : i32
    %c2048_i32_3 = arith.constant 2048 : i32
    %6 = arith.cmpi sle, %5, %c2048_i32_3 : i32
    %7 = arith.extui %6 : i1 to i32
    %c0_i32_4 = arith.constant 0 : i32
    %8 = arith.cmpi ne, %7, %c0_i32_4 : i32
    scf.if %8 {
      %c0 = arith.constant 0 : index
      %c0_11 = arith.constant 0 : index
      %18 = vector.load %arg1[%c0, %c0_11] : memref<16x128xf32, #tpu.memory_space<vmem>>, vector<16x128xf32>
      %cst = arith.constant 0.000000e+00 : f32
      %19 = vector.broadcast %cst : f32 to vector<16x128xf32>
      %20 = arith.maximumf %18, %19 : vector<16x128xf32>
      %cst_12 = arith.constant 1.000000e+00 : f32
      %21 = vector.broadcast %cst_12 : f32 to vector<16x128xf32>
      %22 = arith.mulf %18, %21 : vector<16x128xf32>
      %23 = arith.subf %20, %22 : vector<16x128xf32>
      %24 = math.absf %18 : vector<16x128xf32>
      %cst_13 = arith.constant 0.000000e+00 : f32
      %25 = vector.broadcast %cst_13 : f32 to vector<16x128xf32>
      %26 = arith.subf %25, %24 : vector<16x128xf32>
      %27 = math.exp %26 : vector<16x128xf32>
      %cst_14 = arith.constant 1.000000e+00 : f32
      %28 = vector.broadcast %cst_14 : f32 to vector<16x128xf32>
      %29 = arith.addf %28, %27 : vector<16x128xf32>
      %30 = math.log %29 : vector<16x128xf32>
      %31 = arith.addf %23, %30 : vector<16x128xf32>
      %c0_15 = arith.constant 0 : index
      %c0_16 = arith.constant 0 : index
      %32 = vector.load %arg3[%c0_15, %c0_16] : memref<8x128xf32, #tpu.memory_space<vmem>>, vector<8x128xf32>
      %33 = vector.shape_cast %31 : vector<16x128xf32> to vector<2x8x128xf32>
      %cst_17 = arith.constant dense<0.000000e+00> : vector<8x128xf32>
      %34 = vector.multi_reduction <add>, %33, %cst_17 [0] : vector<2x8x128xf32> to vector<8x128xf32>
      %35 = arith.addf %32, %34 : vector<8x128xf32>
      %c0_18 = arith.constant 0 : index
      %c0_19 = arith.constant 0 : index
      %36 = vector.load %arg3[%c0_18, %c0_19] : memref<8x128xf32, #tpu.memory_space<vmem>>, vector<8x128xf32>
      tpu.vector_store %arg3[%c0_18, %c0_19], %35 {strides = array<i32>} : memref<8x128xf32, #tpu.memory_space<vmem>>, vector<8x128xf32>,
    } else {
    }
    %c2048_i32_5 = arith.constant 2048 : i32
    %9 = arith.cmpi slt, %4, %c2048_i32_5 : i32
    %c2048_i32_6 = arith.constant 2048 : i32
    %10 = arith.addi %4, %c2048_i32_6 : i32
    %c2048_i32_7 = arith.constant 2048 : i32
    %11 = arith.cmpi sgt, %10, %c2048_i32_7 : i32
    %12 = arith.andi %9, %11 : i1
    %13 = arith.extui %12 : i1 to i32
    %c0_i32_8 = arith.constant 0 : i32
    %14 = arith.cmpi ne, %13, %c0_i32_8 : i32
    scf.if %14 {
      %c0 = arith.constant 0 : index
      %c0_11 = arith.constant 0 : index
      %18 = vector.load %arg1[%c0, %c0_11] : memref<16x128xf32, #tpu.memory_space<vmem>>, vector<16x128xf32>
      %cst = arith.constant 0.000000e+00 : f32
      %19 = vector.broadcast %cst : f32 to vector<16x128xf32>
      %20 = arith.maximumf %18, %19 : vector<16x128xf32>
      %cst_12 = arith.constant 1.000000e+00 : f32
      %21 = vector.broadcast %cst_12 : f32 to vector<16x128xf32>
      %22 = arith.mulf %18, %21 : vector<16x128xf32>
      %23 = arith.subf %20, %22 : vector<16x128xf32>
      %24 = math.absf %18 : vector<16x128xf32>
      %cst_13 = arith.constant 0.000000e+00 : f32
      %25 = vector.broadcast %cst_13 : f32 to vector<16x128xf32>
      %26 = arith.subf %25, %24 : vector<16x128xf32>
      %27 = math.exp %26 : vector<16x128xf32>
      %cst_14 = arith.constant 1.000000e+00 : f32
      %28 = vector.broadcast %cst_14 : f32 to vector<16x128xf32>
      %29 = arith.addf %28, %27 : vector<16x128xf32>
      %30 = math.log %29 : vector<16x128xf32>
      %31 = arith.addf %23, %30 : vector<16x128xf32>
      %32 = tpu.iota {dimensions = array<i32: 0>} : vector<16x128xi32>
      %33 = tpu.iota {dimensions = array<i32: 1>} : vector<16x128xi32>
      %c128_i32 = arith.constant 128 : i32
      %34 = vector.broadcast %c128_i32 : i32 to vector<16x128xi32>
      %35 = arith.muli %32, %34 : vector<16x128xi32>
      %36 = vector.broadcast %4 : i32 to vector<16x128xi32>
      %37 = arith.addi %36, %35 : vector<16x128xi32>
      %38 = arith.addi %37, %33 : vector<16x128xi32>
      %c2048_i32_15 = arith.constant 2048 : i32
      %39 = vector.broadcast %c2048_i32_15 : i32 to vector<16x128xi32>
      %40 = arith.cmpi slt, %38, %39 : vector<16x128xi32>
      %cst_16 = arith.constant 0.000000e+00 : f32
      %41 = vector.broadcast %cst_16 : f32 to vector<16x128xf32>
      %42 = arith.select %40, %31, %41 : vector<16x128xi1>, vector<16x128xf32>
      %c0_17 = arith.constant 0 : index
      %c0_18 = arith.constant 0 : index
      %43 = vector.load %arg3[%c0_17, %c0_18] : memref<8x128xf32, #tpu.memory_space<vmem>>, vector<8x128xf32>
      %44 = vector.shape_cast %42 : vector<16x128xf32> to vector<2x8x128xf32>
      %cst_19 = arith.constant dense<0.000000e+00> : vector<8x128xf32>
      %45 = vector.multi_reduction <add>, %44, %cst_19 [0] : vector<2x8x128xf32> to vector<8x128xf32>
      %46 = arith.addf %43, %45 : vector<8x128xf32>
      %c0_20 = arith.constant 0 : index
      %c0_21 = arith.constant 0 : index
      %47 = vector.load %arg3[%c0_20, %c0_21] : memref<8x128xf32, #tpu.memory_space<vmem>>, vector<8x128xf32>
      tpu.vector_store %arg3[%c0_20, %c0_21], %46 {strides = array<i32>} : memref<8x128xf32, #tpu.memory_space<vmem>>, vector<8x128xf32>,
    } else {
    }
    %c0_i32_9 = arith.constant 0 : i32
    %15 = arith.cmpi eq, %arg0, %c0_i32_9 : i32
    %16 = arith.extui %15 : i1 to i32
    %c0_i32_10 = arith.constant 0 : i32
    %17 = arith.cmpi ne, %16, %c0_i32_10 : i32
    scf.if %17 {
      %c0 = arith.constant 0 : index
      %c0_11 = arith.constant 0 : index
      %18 = vector.load %arg3[%c0, %c0_11] : memref<8x128xf32, #tpu.memory_space<vmem>>, vector<8x128xf32>
      %c0_12 = arith.constant 0 : index
      %c0_13 = arith.constant 0 : index
      %19 = vector.load %arg2[%c0_12, %c0_13] : memref<8x128xf32, #tpu.memory_space<vmem>>, vector<8x128xf32>
      tpu.vector_store %arg2[%c0_12, %c0_13], %18 {strides = array<i32>} : memref<8x128xf32, #tpu.memory_space<vmem>>, vector<8x128xf32>,
    } else {
    }
    return
  }
  func.func @transform_0(%arg0: i32) -> (i32, i32) {
    %c0_i32 = arith.constant 0 : i32
    %c0_i32_0 = arith.constant 0 : i32
    return %arg0, %c0_i32 : i32, i32
  }
  func.func @transform_1(%arg0: i32) -> (i32, i32) {
    %c0_i32 = arith.constant 0 : i32
    %c0_i32_0 = arith.constant 0 : i32
    %c0_i32_1 = arith.constant 0 : i32
    return %c0_i32, %c0_i32_0 : i32, i32
  }
}

</mosaic_0001>

<bundles_post_ra>
// kernel: fn.1
= control target key start
LH: loop header
LB: loop body
LE: loop exit
PB: predicated region body
PF: predicated region fallthrough
CT: control target
= control target key end

     0   :  { %s129_s0 = inlined_call_operand.vmem [shape: f32[16,128], index: 0, kind: input, shape index: {}]   ;;  %s130_s1 = inlined_call_operand.vmem [shape: f32[8,128], index: 1, kind: output, shape index: {}]  }
   0x1   :  { %v19_v0 = vld [vmem:[%s129_s0] sm:$0xff]  ;;  %v20_v1 = vld [vmem:[%s129_s0 + $0x8] sm:$0xff] }
   0x2   :  { %v25_v2 = vand.u32 2147483647, %v19_v0  ;;  %v26_v3 = vand.u32 2147483647, %v20_v1  ;;  %v21_v12 = vmax.f32 %v19_v0, 0.0  ;;  %v22_v13 = vmax.f32 %v20_v1, 0.0 }
   0x4   :  { %v27_v4 = vsub.f32 0.0, %v25_v2  ;;  %v28_v5 = vsub.f32 0.0, %v26_v3  ;;  %v23_v14 = vsub.f32 %v21_v12, %v19_v0  ;;  %v24_v16 = vsub.f32 %v22_v13, %v20_v1 }
   0x6   :  { %v29_v6 = vmul.f32 1.442695, %v27_v4  ;;  %v31_v7 = vmul.f32 1.442695, %v28_v5 }
   0x8   :  { %102 = vpow2.f32 %v29_v6 }
   0x9   :  { %104 = vpow2.f32 %v31_v7 }
   0xe   :  { %v103_v8 = vpop.eup %102 }
   0xf   :  { %v105_v9 = vpop.eup %104  ;;  %v33_v10 = vadd.f32 1.0, %v103_v8 }
  0x10   :  { %v34_v11 = vadd.f32 1.0, %v105_v9 }
  0x11   :  { %106 = vlog2.f32 %v33_v10 }
  0x12   :  { %108 = vlog2.f32 %v34_v11 }
  0x17   :  { %v107_v15 = vpop.eup %106 }
  0x18   :  { %v109_v17 = vpop.eup %108  ;;  %v36_v18 = vmul.f32 0.6931472, %v107_v15 }
  0x19   :  { %v38_v19 = vmul.f32 0.6931472, %v109_v17 }
  0x1a   :  { %v39_v20 = vadd.f32 %v36_v18, %v23_v14 }
  0x1b   :  { %v40_v21 = vadd.f32 %v38_v19, %v24_v16 }
  0x1d   :  { %v42_v22 = vadd.f32 %v40_v21, %v39_v20 }
  0x1f   :  { %97 = vst [vmem:[%s130_s1] sm:$0xff] %v42_v22 }

</bundles_post_ra>
